<compile_context>
chip_gen: v7x
topology: tpu7x:2x2x1
jax: 0.10.0
libtpu: 0.0.40
codegen_flags: <defaults>
</compile_context>

<pallas_src>
import jax
import jax.numpy as jnp
from jax.experimental import pallas as pl
from jax.experimental.pallas import tpu as pltpu

IN_F = 28 * 28   # 784
H1_F = 128
H2_F = 64
OUT_F = 10
OUT_PAD = 128    # lane-dense padded output width


def _mlp_kernel(x_ref, w1_ref, b1_ref, w2_ref, b2_ref, w3_ref, b3_ref, o_ref):
    # One batch tile per grid step; all three matmuls on the MXU with bf16
    # operands and f32 accumulation, ReLUs on the VPU.
    x = x_ref[...].astype(jnp.bfloat16)                     # (TB, 784) bf16
    h1 = jnp.dot(x, w1_ref[...], preferred_element_type=jnp.float32)
    h1 = jnp.maximum(h1 + b1_ref[...], 0.0).astype(jnp.bfloat16)
    h2 = jnp.dot(h1, w2_ref[...], preferred_element_type=jnp.float32)
    h2 = jnp.maximum(h2 + b2_ref[...], 0.0).astype(jnp.bfloat16)
    logits = jnp.dot(h2, w3_ref[...], preferred_element_type=jnp.float32)
    o_ref[...] = (logits + b3_ref[...]).astype(o_ref.dtype)  # (TB, 128) f32


def mlp_forward(x_flat, params, tb=1024):
    """x_flat: [B, 784] float32. params: dict of w1,b1,w2,b2,w3,b3 (f32)."""
    B, K = x_flat.shape
    assert K == IN_F

    # MXU fast path: bf16 weights (cast once per call, not per grid step).
    w1 = params["w1"].astype(jnp.bfloat16)                   # (784, 128)
    w2 = params["w2"].astype(jnp.bfloat16)                   # (128, 64)
    # Lane-dense final layer: pad 10 -> 128 output columns with zeros.
    w3 = jnp.zeros((H2_F, OUT_PAD), jnp.bfloat16).at[:, :OUT_F].set(
        params["w3"].astype(jnp.bfloat16))
    b1 = params["b1"].astype(jnp.float32)                    # (1, 128)
    b2 = params["b2"].astype(jnp.float32)                    # (1, 64)
    b3 = jnp.zeros((1, OUT_PAD), jnp.float32).at[:, :OUT_F].set(
        params["b3"].astype(jnp.float32))

    # Batch tile: clamp to the (sublane-rounded) batch so tiny batches don't
    # allocate a huge padded block.
    tb = min(tb, max(8, ((B + 7) // 8) * 8))
    grid = (pl.cdiv(B, tb),)

    resident = lambda i: (0, 0)  # weights/biases: same block every grid step
    param_bytes = (w1.size * 2 + w2.size * 2 + w3.size * 2
                   + b1.size * 4 + b2.size * 4 + b3.size * 4)
    cost = pl.CostEstimate(
        flops=2 * B * (IN_F * H1_F + H1_F * H2_F + H2_F * OUT_PAD),
        transcendentals=0,
        bytes_accessed=B * IN_F * 4 + B * OUT_PAD * 4 + param_bytes,
    )

    out_padded = pl.pallas_call(
        _mlp_kernel,
        out_shape=jax.ShapeDtypeStruct((B, OUT_PAD), jnp.float32),
        grid=grid,
        in_specs=[
            pl.BlockSpec((tb, IN_F), lambda i: (i, 0)),      # x tile (pipelined)
            pl.BlockSpec((IN_F, H1_F), resident),            # w1
            pl.BlockSpec((1, H1_F), resident),               # b1
            pl.BlockSpec((H1_F, H2_F), resident),            # w2
            pl.BlockSpec((1, H2_F), resident),               # b2
            pl.BlockSpec((H2_F, OUT_PAD), resident),         # w3 (padded)
            pl.BlockSpec((1, OUT_PAD), resident),            # b3 (padded)
        ],
        out_specs=pl.BlockSpec((tb, OUT_PAD), lambda i: (i, 0)),
        compiler_params=pltpu.CompilerParams(
            dimension_semantics=("parallel",)),
        cost_estimate=cost,
    )(x_flat, w1, b1, w2, b2, w3, b3)

    return out_padded[:, :OUT_F]


def init_params(key):
    """Deterministic init mimicking nn.Linear default (U[-1/sqrt(fan_in), +])."""
    def linear(k, fan_in, fan_out):
        kw, kb = jax.random.split(k)
        bound = 1.0 / jnp.sqrt(fan_in)
        w = jax.random.uniform(kw, (fan_in, fan_out), jnp.float32, -bound, bound)
        b = jax.random.uniform(kb, (1, fan_out), jnp.float32, -bound, bound)
        return w, b

    k1, k2, k3 = jax.random.split(key, 3)
    w1, b1 = linear(k1, IN_F, H1_F)
    w2, b2 = linear(k2, H1_F, H2_F)
    w3, b3 = linear(k3, H2_F, OUT_F)
    return {"w1": w1, "b1": b1, "w2": w2, "b2": b2, "w3": w3, "b3": b3}


def neural_network_forward(x, params, needs_flattened=True):
    if needs_flattened:
        x = x.reshape(x.shape[0], -1)  # torch.flatten(x, start_dim=1)
    return mlp_forward(x, params)


def _reference(x, params, needs_flattened=True):
    if needs_flattened:
        x = x.reshape(x.shape[0], -1)
    h1 = jnp.maximum(x @ params["w1"] + params["b1"], 0.0)
    h2 = jnp.maximum(h1 @ params["w2"] + params["b2"], 0.0)
    return h2 @ params["w3"] + params["b3"]


if __name__ == "__main__":
    key = jax.random.PRNGKey(0)
    kx, kp = jax.random.split(key)

    batch = 2
    x = jax.random.normal(kx, (batch, 1, 28, 28), dtype=jnp.float32)  # NCHW
    params = init_params(kp)

    out = neural_network_forward(x, params, needs_flattened=True)
    out = jax.block_until_ready(out)

    ref = _reference(x, params, needs_flattened=True)
    assert out.shape == (batch, 10)
    # bf16 matmul operands (f32 accumulation) -> loosened tolerance vs f32 ref.
    assert jnp.allclose(out, ref, atol=5e-2, rtol=5e-2), "mismatch vs reference"

    print("KERNEL_OK")
</pallas_src>

<mosaic_0001>
module attributes {stable_mosaic.version = 11 : i64} {
  func.func @_mlp_kernel(%arg0: i32, %arg1: memref<8x784xf32, #tpu.memory_space<vmem>>, %arg2: memref<784x128xbf16, #tpu.memory_space<vmem>>, %arg3: memref<1x128xf32, #tpu.memory_space<vmem>>, %arg4: memref<128x64xbf16, #tpu.memory_space<vmem>>, %arg5: memref<1x64xf32, #tpu.memory_space<vmem>>, %arg6: memref<64x128xbf16, #tpu.memory_space<vmem>>, %arg7: memref<1x128xf32, #tpu.memory_space<vmem>>, %arg8: memref<8x128xf32, #tpu.memory_space<vmem>>) attributes {dimension_semantics = [#tpu.dimension_semantics<parallel>], iteration_bounds = array<i64: 1>, scalar_prefetch = 0 : i64, scratch_operands = 0 : i64, tpu.core_type = #tpu.core_type<tc>, window_params = [{transform_indices = @transform_0, window_bounds = array<i64: 8, 784>}, {pipeline_mode = #tpu.pipeline_mode<synchronous>, transform_indices = @transform_1, window_bounds = array<i64: 784, 128>}, {pipeline_mode = #tpu.pipeline_mode<synchronous>, transform_indices = @transform_2, window_bounds = array<i64: 1, 128>}, {pipeline_mode = #tpu.pipeline_mode<synchronous>, transform_indices = @transform_3, window_bounds = array<i64: 128, 64>}, {pipeline_mode = #tpu.pipeline_mode<synchronous>, transform_indices = @transform_4, window_bounds = array<i64: 1, 64>}, {pipeline_mode = #tpu.pipeline_mode<synchronous>, transform_indices = @transform_5, window_bounds = array<i64: 64, 128>}, {pipeline_mode = #tpu.pipeline_mode<synchronous>, transform_indices = @transform_6, window_bounds = array<i64: 1, 128>}, {transform_indices = @transform_7, window_bounds = array<i64: 8, 128>}]} {
    %c0 = arith.constant 0 : index
    %c0_0 = arith.constant 0 : index
    %0 = vector.load %arg1[%c0, %c0_0] : memref<8x784xf32, #tpu.memory_space<vmem>>, vector<8x784xf32>
    %1 = arith.truncf %0 : vector<8x784xf32> to vector<8x784xbf16>
    %c0_1 = arith.constant 0 : index
    %c0_2 = arith.constant 0 : index
    %2 = vector.load %arg2[%c0_1, %c0_2] : memref<784x128xbf16, #tpu.memory_space<vmem>>, vector<784x128xbf16>
    %cst = arith.constant dense<0.000000e+00> : vector<8x128xf32>
    %3 = tpu.matmul %1, %2, %cst {dimension_numbers = #tpu.dot_dimension_numbers<[1], [0], [0], [1], [0, 0, 1, 1], [], []>} : vector<8x784xbf16>, vector<784x128xbf16>, vector<8x128xf32> -> vector<8x128xf32>
    %c0_3 = arith.constant 0 : index
    %c0_4 = arith.constant 0 : index
    %4 = vector.load %arg3[%c0_3, %c0_4] : memref<1x128xf32, #tpu.memory_space<vmem>>, vector<1x128xf32>
    %5 = vector.broadcast %4 : vector<1x128xf32> to vector<8x128xf32>
    %6 = arith.addf %3, %5 : vector<8x128xf32>
    %cst_5 = arith.constant 0.000000e+00 : f32
    %7 = vector.broadcast %cst_5 : f32 to vector<8x128xf32>
    %8 = arith.maximumf %6, %7 : vector<8x128xf32>
    %9 = arith.truncf %8 : vector<8x128xf32> to vector<8x128xbf16>
    %c0_6 = arith.constant 0 : index
    %c0_7 = arith.constant 0 : index
    %10 = vector.load %arg4[%c0_6, %c0_7] : memref<128x64xbf16, #tpu.memory_space<vmem>>, vector<128x64xbf16>
    %cst_8 = arith.constant dense<0.000000e+00> : vector<8x64xf32>
    %11 = tpu.matmul %9, %10, %cst_8 {dimension_numbers = #tpu.dot_dimension_numbers<[1], [0], [0], [1], [0, 0, 1, 1], [], []>} : vector<8x128xbf16>, vector<128x64xbf16>, vector<8x64xf32> -> vector<8x64xf32>
    %c0_9 = arith.constant 0 : index
    %c0_10 = arith.constant 0 : index
    %12 = vector.load %arg5[%c0_9, %c0_10] : memref<1x64xf32, #tpu.memory_space<vmem>>, vector<1x64xf32>
    %13 = vector.broadcast %12 : vector<1x64xf32> to vector<8x64xf32>
    %14 = arith.addf %11, %13 : vector<8x64xf32>
    %cst_11 = arith.constant 0.000000e+00 : f32
    %15 = vector.broadcast %cst_11 : f32 to vector<8x64xf32>
    %16 = arith.maximumf %14, %15 : vector<8x64xf32>
    %17 = arith.truncf %16 : vector<8x64xf32> to vector<8x64xbf16>
    %c0_12 = arith.constant 0 : index
    %c0_13 = arith.constant 0 : index
    %18 = vector.load %arg6[%c0_12, %c0_13] : memref<64x128xbf16, #tpu.memory_space<vmem>>, vector<64x128xbf16>
    %cst_14 = arith.constant dense<0.000000e+00> : vector<8x128xf32>
    %19 = tpu.matmul %17, %18, %cst_14 {dimension_numbers = #tpu.dot_dimension_numbers<[1], [0], [0], [1], [0, 0, 1, 1], [], []>} : vector<8x64xbf16>, vector<64x128xbf16>, vector<8x128xf32> -> vector<8x128xf32>
    %c0_15 = arith.constant 0 : index
    %c0_16 = arith.constant 0 : index
    %20 = vector.load %arg7[%c0_15, %c0_16] : memref<1x128xf32, #tpu.memory_space<vmem>>, vector<1x128xf32>
    %21 = vector.broadcast %20 : vector<1x128xf32> to vector<8x128xf32>
    %22 = arith.addf %19, %21 : vector<8x128xf32>
    %c0_17 = arith.constant 0 : index
    %c0_18 = arith.constant 0 : index
    %23 = vector.load %arg8[%c0_17, %c0_18] : memref<8x128xf32, #tpu.memory_space<vmem>>, vector<8x128xf32>
    tpu.vector_store %arg8[%c0_17, %c0_18], %22 {strides = array<i32>} : memref<8x128xf32, #tpu.memory_space<vmem>>, vector<8x128xf32>,
    return
  }
  func.func @transform_0(%arg0: i32) -> (i32, i32) {
    %c0_i32 = arith.constant 0 : i32
    %c0_i32_0 = arith.constant 0 : i32
    return %arg0, %c0_i32 : i32, i32
  }
  func.func @transform_1(%arg0: i32) -> (i32, i32) {
    %c0_i32 = arith.constant 0 : i32
    %c0_i32_0 = arith.constant 0 : i32
    %c0_i32_1 = arith.constant 0 : i32
    return %c0_i32, %c0_i32_0 : i32, i32
  }
  func.func @transform_2(%arg0: i32) -> (i32, i32) {
    %c0_i32 = arith.constant 0 : i32
    %c0_i32_0 = arith.constant 0 : i32
    %c0_i32_1 = arith.constant 0 : i32
    return %c0_i32, %c0_i32_0 : i32, i32
  }
  func.func @transform_3(%arg0: i32) -> (i32, i32) {
    %c0_i32 = arith.constant 0 : i32
    %c0_i32_0 = arith.constant 0 : i32
    %c0_i32_1 = arith.constant 0 : i32
    return %c0_i32, %c0_i32_0 : i32, i32
  }
  func.func @transform_4(%arg0: i32) -> (i32, i32) {
    %c0_i32 = arith.constant 0 : i32
    %c0_i32_0 = arith.constant 0 : i32
    %c0_i32_1 = arith.constant 0 : i32
    return %c0_i32, %c0_i32_0 : i32, i32
  }
  func.func @transform_5(%arg0: i32) -> (i32, i32) {
    %c0_i32 = arith.constant 0 : i32
    %c0_i32_0 = arith.constant 0 : i32
    %c0_i32_1 = arith.constant 0 : i32
    return %c0_i32, %c0_i32_0 : i32, i32
  }
  func.func @transform_6(%arg0: i32) -> (i32, i32) {
    %c0_i32 = arith.constant 0 : i32
    %c0_i32_0 = arith.constant 0 : i32
    %c0_i32_1 = arith.constant 0 : i32
    return %c0_i32, %c0_i32_0 : i32, i32
  }
  func.func @transform_7(%arg0: i32) -> (i32, i32) {
    %c0_i32 = arith.constant 0 : i32
    %c0_i32_0 = arith.constant 0 : i32
    return %arg0, %c0_i32 : i32, i32
  }
}

</mosaic_0001>

<bundles_post_ra>
// kernel: tpu_custom_call.1
= control target key start
LH: loop header
LB: loop body
LE: loop exit
PB: predicated region body
PF: predicated region fallthrough
CT: control target
= control target key end

     0   :  { %12 = vsyncpa [#allocation3], 0  ;;  %s1410_s0 = inlined_call_operand.vmem [shape: f32[2,784], index: 0, kind: input, shape index: {}]   ;;  %s1411_s1 = inlined_call_operand.hbm [shape: bf16[784,128], index: 1, kind: input, shape index: {}]   ;;  %s1412_s2 = inlined_call_operand.vmem [shape: f32[1,128], index: 2, kind: input, shape index: {}]   ;;  %s1413_s3 = inlined_call_operand.vmem [shape: bf16[128,64], index: 3, kind: input, shape index: {}]   ;;  %s1414_s4 = inlined_call_operand.vmem [shape: f32[1,64], index: 4, kind: input, shape index: {}]   ;;  %s1415_s5 = inlined_call_operand.vmem [shape: bf16[64,128], index: 5, kind: input, shape index: {}]   ;;  %s1416_s6 = inlined_call_operand.vmem [shape: f32[1,128], index: 6, kind: input, shape index: {}]   ;;  %s1417_s7 = inlined_call_operand.hbm [shape: f32[2,128], index: 7, kind: output, shape index: {}]  }
   0x1   :  { %13 = vsyncpa [#allocation4], 0  ;;  %s1238_s24 = smov [#allocation2]   ;;  %s1190_s28 = scalar_lea.hbm %s1411_s1, 6272 }
   0x2   :  { %s21_s25 = sshll.u32 %s1238_s24, 4  ;;  %p1191_p0 = scmp.ne.s32.totalorder %s1411_s1, %s1190_s28  ;;  %s22_s25 = int_to_ptr.vmem [resolvable:$true] %s21_s25 }
   0x3   :  { %p1194_p1 = scmp.lt.u32.totalorder %s1190_s28, %s1411_s1 }
   0x5   :  { %p1196_p2 = pnand %p1194_p1, %p1191_p0 }
   0x7   :  { %1199 = shalt.err (!%p1196_p2)
}
   0x8   :  { %s1200_s10 = scalar_lea.vmem %s22_s25, 6272  ;;  %p1205_p4 = scmp.lt.s32.totalorder %s22_s25, %s22_s25 }
   0x9   :  { %p1201_p3 = scmp.ne.s32.totalorder %s22_s25, %s1200_s10  ;;  %p1206_p5 = scmp.lt.s32.totalorder %s1200_s10, %s1200_s10 }
   0xb   :  { %p1207_p6 = por %p1206_p5, %p1205_p4 }
   0xd   :  { %p1208_p7 = pnand %p1207_p6, %p1201_p3 }
   0xf   :  { %1211 = shalt.err (!%p1208_p7)
}
  0x10   :  { %s1239_s11 = smov 64   ;;  %s1240_s12 = smov 4  }
  0x11   :  { %27 = dma.hbm_to_vmem [thread:$0]  %s1411_s1, 6272, %s22_s25, [#allocation3], %s1239_s11, %s1239_s11, %s1240_s12  }
  0x12   :  { %1234 = dma.done.wait [#allocation3], 6272  }
  0x13   :  { %1235 = vsyncadd [#allocation3], 4294961024  ;;  %v1117_v0 = vld [vmem:[#allocation2 + $0x40] sm:$0xff]   ;;  %v1121_v4 = vld [vmem:[#allocation2 + $0x48] sm:$0xff]   ;;  %v1241_v23 = vmov 1983009808   ;;  %v65_v25 = vlaneseq }
  0x14   :  { %v1118_v1 = vld [vmem:[#allocation2] sm:$0xff]   ;;  %988 = vmatprep.subr.bf16.mxu0 %v1117_v0  ;;  %v1122_v5 = vld [vmem:[#allocation2 + $0x8] sm:$0xff]   ;;  %v1125_v8 = vld [vmem:[#allocation2 + $0x50] sm:$0xff]   ;;  %v63_v24 = vunpack.c.l.s4 %v1241_v23  ;;  %v1242_v47 = vmov 0.0   ;;  %vm1243_vm0 = vmmov 0   ;;  %vm542_vm1 = vcmask 130048  }
  0x15   :  { %v1119_v2 = vld [vmem:[#allocation2 + $0xc0] sm:$0xff]   ;;  %989 = vmatpush3.bf16.msra.mxu0 %v1118_v1  ;;  %v1123_v6 = vld [vmem:[#allocation2 + $0xc8] sm:$0xff]   ;;  %v1126_v9 = vld [vmem:[#allocation2 + $0x10] sm:$0xff]   ;;  %v66_v31 = vshrl.u32 %v65_v25, 7  ;;  %vm860_vm2 = vcmask 523264  }
  0x16   :  { %v1120_v3 = vld [vmem:[#allocation2 + $0x80] sm:$0xff]   ;;  %1010 = vmatprep.subr.bf16.mxu1 %v1119_v2  ;;  %990 = vmatprep.subr.bf16.mxu0 %v1121_v4  ;;  %v1124_v7 = vld [vmem:[#allocation2 + $0x88] sm:$0xff]   ;;  %v1127_v10 = vld [vmem:[#allocation2 + $0xd0] sm:$0xff]   ;;  %v64_v30 = vunpack.c.0.s8 %v63_v24 }
  0x17   :  { %1011 = vmatpush3.bf16.msra.mxu1 %v1120_v3  ;;  %v1128_v11 = vld [vmem:[#allocation2 + $0x90] sm:$0xff]   ;;  %v1129_v12 = vld [vmem:[#allocation2 + $0x58] sm:$0xff]   ;;  %v1133_v16 = vld [vmem:[#allocation2 + $0x60] sm:$0xff]  }
  0x18   :  { %1012 = vmatprep.subr.bf16.mxu1 %v1123_v6  ;;  %v1130_v13 = vld [vmem:[#allocation2 + $0x18] sm:$0xff]   ;;  %v1134_v17 = vld [vmem:[#allocation2 + $0x20] sm:$0xff]   ;;  %v1137_v20 = vld [vmem:[#allocation2 + $0x68] sm:$0xff]   ;;  %v1299_v36 = vsub.s32 %v64_v30, %v66_v31 }
  0x19   :  { %991 = vmatpush3.bf16.msra.mxu0 %v1122_v5  ;;  %v1131_v14 = vld [vmem:[#allocation2 + $0xd8] sm:$0xff]   ;;  %v1135_v18 = vld [vmem:[#allocation2 + $0xe0] sm:$0xff]   ;;  %v1138_v21 = vld [vmem:[#allocation2 + $0x28] sm:$0xff]  }
  0x1a   :  { %992 = vmatprep.subr.bf16.mxu0 %v1125_v8  ;;  %v1132_v15 = vld [vmem:[#allocation2 + $0x98] sm:$0xff]   ;;  %v1136_v19 = vld [vmem:[#allocation2 + $0xa0] sm:$0xff]   ;;  %v1139_v22 = vld [vmem:[#allocation2 + $0xe8] sm:$0xff]  }
  0x1b   :  { %1013 = vmatpush3.bf16.msra.mxu1 %v1124_v7  ;;  %v1140_v26 = vld [vmem:[#allocation2 + $0xa8] sm:$0xff]   ;;  %v1141_v27 = vld [vmem:[#allocation2 + $0x70] sm:$0xff]   ;;  %v1145_v33 = vld [vmem:[#allocation2 + $0x78] sm:$0xff]  }
  0x1c   :  { %1014 = vmatprep.subr.bf16.mxu1 %v1127_v10  ;;  %v1142_v28 = vld [vmem:[#allocation2 + $0x30] sm:$0xff]   ;;  %v1146_v34 = vld [vmem:[#allocation2 + $0x38] sm:$0xff]   ;;  %v1153_v42 = vld [vmem:[#allocation2 + $0x140] sm:$0xff]  }
  0x1d   :  { %993 = vmatpush3.bf16.msra.mxu0 %v1126_v9  ;;  %v1143_v29 = vld [vmem:[#allocation2 + $0xf0] sm:$0xff]   ;;  %v1147_v35 = vld [vmem:[#allocation2 + $0xf8] sm:$0xff]   ;;  %v1156_v52 = vld [vmem:[#allocation2 + $0x100] sm:$0xff]  }
  0x1e   :  { %994 = vmatprep.subr.bf16.mxu0 %v1129_v12  ;;  %v1144_v32 = vld [vmem:[#allocation2 + $0xb0] sm:$0xff]   ;;  %v1150_v38 = vld [vmem:[%s1410_s0 + $0x1c] ss:$14 sps:$4 sm:$0xff]   ;;  %v1163_v63 = vld [vmem:[#allocation2 + $0x160] sm:$0xff]  }
  0x1f   :  { %1015 = vmatpush3.bf16.msra.mxu1 %v1128_v11  ;;  %v1148_v37 = vld [vmem:[%s1410_s0] ss:$14 sps:$4 sm:$0xff]   ;;  %v1152_v39 = vld [vmem:[#allocation2 + $0xb8] sm:$0xff]   ;;  %v82_v41 = vrot.slane %v1150_v38, %v1299_v36  ;;  %v1154_v43 = vld [vmem:[%s1410_s0 + $0x4] ss:$14 sps:$4 sm:$0xff]  }
  0x20   :  { %1016 = vmatprep.subr.bf16.mxu1 %v1131_v14  ;;  %v68_v40 = vrot.slane %v1148_v37, %v1299_v36  ;;  %v1155_v44 = vld [vmem:[%s1410_s0 + $0x20] ss:$14 sps:$4 sm:$0xff]   ;;  %v75_v48 = vrot.slane %v1154_v43, %v1299_v36  ;;  %v1161_v61 = vld [vmem:[#allocation2 + $0x158] sm:$0xff]   ;;  %v1175_v5 = vld [vmem:[%s1410_s0 + $0x24] ss:$14 sps:$4 sm:$0xff]  }
  0x21   :  { %995 = vmatpush3.bf16.msra.mxu0 %v1130_v13  ;;  %v89_v49 = vrot.slane %v1155_v44, %v1299_v36  ;;  %v1157_v55 = vld [vmem:[#allocation2 + $0x148] sm:$0xff]   ;;  %v1159_v59 = vld [vmem:[#allocation2 + $0x150] sm:$0xff]   ;;  %v1162_v62 = vld [vmem:[#allocation2 + $0x118] sm:$0xff]   ;;  %v118_v10 = vrot.slane %v1175_v5, %v1299_v36 }
  0x22   :  { %996 = vmatprep.subr.bf16.mxu0 %v1133_v16  ;;  %v91_v45 = vcombine.high %v68_v40, %v82_v41  ;;  %v90_v46 = vcombine.low %v68_v40, %v82_v41  ;;  %v1158_v58 = vld [vmem:[#allocation2 + $0x108] sm:$0xff]   ;;  %v1160_v60 = vld [vmem:[#allocation2 + $0x110] sm:$0xff]   ;;  %v1171_v0 = vld [vmem:[#allocation2 + $0x180] sm:$0xff]  }
  0x23   :  { %1017 = vmatpush3.bf16.msra.mxu1 %v1132_v15  ;;  %v93_v53 = vcombine.high %v75_v48, %v89_v49  ;;  %v92_v54 = vcombine.low %v75_v48, %v89_v49  ;;  %v1164_v1 = vld [vmem:[#allocation2 + $0x120] sm:$0xff]   ;;  %v1172_v2 = vld [vmem:[%s1410_s0 + $0x8] ss:$14 sps:$4 sm:$0xff]   ;;  %v1174_v3 = vld [vmem:[%s1410_s0 + $0xc] ss:$14 sps:$4 sm:$0x33]  }
  0x24   :  { %1018 = vmatprep.subr.bf16.mxu1 %v1135_v18  ;;  %v137_v50 = vpack.c.bf16 %v91_v45, %v91_v45  ;;  %v136_v51 = vpack.c.bf16 %v90_v46, %v90_v46  ;;  %v1165_v4 = vld [vmem:[#allocation2 + $0x168] sm:$0xff]   ;;  %v104_v7 = vrot.slane %v1172_v2, %v1299_v36  ;;  %v111_v8 = vrot.slane %v1174_v3, %v1299_v36  ;;  %v1167_v12 = vld [vmem:[#allocation2 + $0x170] sm:$0xff]   ;;  %v1169_v18 = vld [vmem:[#allocation2 + $0x178] sm:$0xff]  }
  0x25   :  { %997 = vmatpush3.bf16.msra.mxu0 %v1134_v17  ;;  %v139_v56 = vpack.c.bf16 %v93_v53, %v93_v53  ;;  %v138_v57 = vpack.c.bf16 %v92_v54, %v92_v54  ;;  %v1177_v6 = vld [vmem:[%s1410_s0 + $0x28] ss:$14 sps:$4 sm:$0x33]   ;;  %v1181_v25 = vld [vmem:[%s1413_s3 + $0x18] sm:$0xff]   ;;  %v1186_v30 = vld [vmem:[%s1415_s5] sm:$0xff]  }
  0x26   :  { %998 = vmatprep.subr.bf16.mxu0 %v1137_v20  ;;  %578 = vmatprep.mubr.bf16.mxu0 %v137_v50  ;;  %v1166_v9 = vld [vmem:[#allocation2 + $0x128] sm:$0xff]   ;;  %v125_v11 = vrot.slane %v1177_v6, %v1299_v36  ;;  %v127_v13 = vcombine.high %v104_v7, %v118_v10  ;;  %v1168_v15 = vld [vmem:[#allocation2 + $0x130] sm:$0xff]   ;;  %v1170_v20 = vld [vmem:[#allocation2 + $0x138] sm:$0xff]  }
  0x27   :  { %1019 = vmatpush3.bf16.msra.mxu1 %v1136_v19  ;;  %618 = vmatprep.mubr.bf16.mxu1 %v139_v56  ;;  %v126_v19 = vcombine.low %v104_v7, %v118_v10  ;;  %v1179_v23 = vld [vmem:[%s1413_s3 + $0x8] sm:$0xff]   ;;  %v1180_v24 = vld [vmem:[%s1413_s3 + $0x10] sm:$0xff]  }
  0x28   :  { %1020 = vmatprep.subr.bf16.mxu1 %v1139_v22  ;;  %v128_v14 = vcombine.low %v111_v8, %v125_v11  ;;  %v141_v16 = vpack.c.bf16 %v127_v13, %v127_v13  ;;  %v1178_v22 = vld [vmem:[%s1413_s3] sm:$0xff]   ;;  %v1187_v31 = vld [vmem:[%s1415_s5 + $0x8] sm:$0xff]  }
  0x29   :  { %999 = vmatpush3.bf16.msra.mxu0 %v1138_v21  ;;  %v140_v21 = vpack.c.bf16 %v126_v19, %v126_v19 }
  0x2a   :  { %1000 = vmatprep.subr.bf16.mxu0 %v1141_v27  ;;  %v142_v17 = vpack.c.bf16 %v128_v14, %v128_v14  ;;  %v1183_v27 = vld [vmem:[%s1413_s3 + $0x28] sm:$0xff]  }
  0x2b   :  { %1021 = vmatpush3.bf16.msra.mxu1 %v1140_v26  ;;  %v1182_v26 = vld [vmem:[%s1413_s3 + $0x20] sm:$0xff]  }
  0x2c   :  { %1022 = vmatprep.subr.bf16.mxu1 %v1143_v29  ;;  %v1185_v29 = vld [vmem:[%s1413_s3 + $0x38] sm:$0xff]  }
  0x2d   :  { %1001 = vmatpush3.bf16.msra.mxu0 %v1142_v28  ;;  %v1184_v28 = vld [vmem:[%s1413_s3 + $0x30] sm:$0xff]  }
  0x2e   :  { %1002 = vmatprep.subr.bf16.mxu0 %v1145_v33  ;;  %v922_v33 = vld [vmem:[%s1412_s2] ss:$0 sm:$0xff] }
  0x2f   :  { %1023 = vmatpush3.bf16.msra.mxu1 %v1144_v32 }
  0x30   :  { %1024 = vmatprep.subr.bf16.mxu1 %v1147_v35 }
  0x31   :  { %1003 = vmatpush3.bf16.msra.mxu0 %v1146_v34 }
  0x32   :  { %1032 = vmatprep.subr.bf16.mxu0 %v1153_v42 }
  0x33   :  { %1025 = vmatpush3.bf16.msra.mxu1 %v1152_v39 }
  0x34   :  { %1070 = vmatprep.subr.bf16.mxu1 %v1242_v47  ;;  %579 = vmatmul.mubr.bf16.vlgmr.msra.gmra.mrb[0].mxu0 %v136_v51 }
  0x35   :  { %1033 = vmatpush3.bf16.msra.mxu0 %v1156_v52  ;;  %658 = vmatprep.mubr.bf16.mxu0 %v141_v16 }
  0x36   :  { %1034 = vmatprep.subr.bf16.mxu0 %v1157_v55  ;;  %619 = vmatmul.mubr.bf16.vlgmr.msra.gmra.mrb[0].mxu1 %v138_v57 }
  0x37   :  { %1072 = vmatprep.mubr.msk.bf16.mxu1 %vm1243_vm0, %v1242_v47  ;;  %1071 = vmatpush3.bf16.msra.mxu1 %v1171_v0 }
  0x38   :  { %1076 = vmatprep.subr.bf16.mxu1 %v1242_v47 }
  0x39   :  { %1035 = vmatpush3.bf16.msra.mxu0 %v1158_v58 }
  0x3a   :  { %1036 = vmatprep.subr.bf16.mxu0 %v1159_v59  ;;  %v1188_v59 = vld [vmem:[%s1415_s5 + $0x10] sm:$0xff]  }
  0x3d   :  { %1037 = vmatpush3.bf16.msra.mxu0 %v1160_v60  ;;  %v1189_v60 = vld [vmem:[%s1415_s5 + $0x18] sm:$0xff]  }
  0x3e   :  { %1038 = vmatprep.subr.bf16.mxu0 %v1161_v61  ;;  %1073 = vmatmul.mubr.msk.bf16.vlgmr.msra.gmra.mrb[4].mxu1 %vm542_vm1, %v142_v17  ;;  %v973_v61 = vld [vmem:[%s1414_s4] ss:$0 sm:$0xff] }
  0x3f   :  { %1092 = vmatprep.mubr.msk.bf16.mxu1 %vm1243_vm0, %v1242_v47  ;;  %1077 = vmatpush3.bf16.msra.mxu1 %v1178_v22 }
  0x40   :  { %1078 = vmatprep.subr.bf16.mxu1 %v1242_v47 }
  0x41   :  { %1039 = vmatpush3.bf16.msra.mxu0 %v1162_v62 }
  0x42   :  { %1040 = vmatprep.subr.bf16.mxu0 %v1163_v63 }
  0x43   :  { %1079 = vmatpush3.bf16.msra.mxu1 %v1179_v23 }
  0x44   :  { %1080 = vmatprep.subr.bf16.mxu1 %v1242_v47 }
  0x45   :  { %1041 = vmatpush3.bf16.msra.mxu0 %v1164_v1 }
  0x46   :  { %1042 = vmatprep.subr.bf16.mxu0 %v1165_v4 }
  0x47   :  { %1081 = vmatpush3.bf16.msra.mxu1 %v1180_v24 }
  0x48   :  { %1082 = vmatprep.subr.bf16.mxu1 %v1242_v47 }
  0x49   :  { %1043 = vmatpush3.bf16.msra.mxu0 %v1166_v9 }
  0x4a   :  { %1044 = vmatprep.subr.bf16.mxu0 %v1167_v12 }
  0x4b   :  { %1083 = vmatpush3.bf16.msra.mxu1 %v1181_v25 }
  0x4c   :  { %1084 = vmatprep.subr.bf16.mxu1 %v1242_v47 }
  0x4d   :  { %1045 = vmatpush3.bf16.msra.mxu0 %v1168_v15 }
  0x4e   :  { %1046 = vmatprep.subr.bf16.mxu0 %v1169_v18 }
  0x4f   :  { %1085 = vmatpush3.bf16.msra.mxu1 %v1182_v26 }
  0x50   :  { %1086 = vmatprep.subr.bf16.mxu1 %v1242_v47 }
  0x51   :  { %1047 = vmatpush3.bf16.msra.mxu0 %v1170_v20 }
  0x52   :  { %1096 = vmatprep.subr.bf16.mxu0 %v1242_v47 }
  0x53   :  { %1087 = vmatpush3.bf16.msra.mxu1 %v1183_v27 }
  0x54   :  { %659 = vmatmul.mubr.bf16.vlgmr.msra.gmra.mrb[4].mxu0 %v140_v21  ;;  %1088 = vmatprep.subr.bf16.mxu1 %v1242_v47 }
  0x55   :  { %1104 = vmatprep.mubr.msk.bf16.mxu0 %vm1243_vm0, %v1242_v47  ;;  %1097 = vmatpush3.bf16.msra.mxu0 %v1186_v30 }
  0x56   :  { %1098 = vmatprep.subr.bf16.mxu0 %v1242_v47 }
  0x57   :  { %1089 = vmatpush3.bf16.msra.mxu1 %v1184_v28 }
  0x58   :  { %1090 = vmatprep.subr.bf16.mxu1 %v1242_v47 }
  0x59   :  { %1099 = vmatpush3.bf16.msra.mxu0 %v1187_v31 }
  0x5a   :  { %1100 = vmatprep.subr.bf16.mxu0 %v1242_v47 }
  0x5b   :  { %1091 = vmatpush3.bf16.msra.mxu1 %v1185_v29 }
  0x5d   :  { %1101 = vmatpush3.bf16.msra.mxu0 %v1188_v59 }
  0x5e   :  { %1102 = vmatprep.subr.bf16.mxu0 %v1242_v47  ;;  %v982_v47 = vld [vmem:[%s1416_s6] ss:$0 sm:$0xff] }
  0x61   :  { %1103 = vmatpush3.bf16.msra.mxu0 %v1189_v60 }
 0x107   :  { %v1004_v32 = vpop.f32.mrb[0].mxu0 }
 0x108   :  { %v1005_v34 = vpop.f32.mrb[1].mxu0 }
 0x109   :  { %v1006_v35 = vadd.f32 %v1005_v34, %v1004_v32  ;;  %v1007_v36 = vpop.f32.mrb[2].mxu0  ;;  %v1026_v37 = vpop.f32.mrb[0].mxu1 }
 0x10a   :  { %v1008_v38 = vpop.f32.mrb[3].mxu0  ;;  %v1027_v40 = vpop.f32.mrb[1].mxu1 }
 0x10b   :  { %v581_v39 = vadd.f32 %v1006_v35, %v922_v33  ;;  %v1028_v41 = vadd.f32 %v1027_v40, %v1026_v37  ;;  %v1029_v42 = vpop.f32.mrb[2].mxu1 }
 0x10c   :  { %v1030_v43 = vpop.f32.mrb[3].mxu1 }
 0x10d   :  { %v621_v44 = vadd.f32 %v1028_v41, %v581_v39 }
 0x111   :  { %v700_v45 = vpop.f32.mrb[4].mxu1 }
 0x112   :  { %v1074_v46 = vpop.f32.mrb[5].mxu1 }
 0x113   :  { %v703_v48 = vpop.f32.mrb[6].mxu1 }
 0x114   :  { %v1075_v49 = vpop.f32.mrb[7].mxu1 }
 0x127   :  { %v1048_v50 = vpop.f32.mrb[4].mxu0 }
 0x128   :  { %v1049_v51 = vpop.f32.mrb[5].mxu0 }
 0x129   :  { %v1050_v52 = vadd.f32 %v1049_v51, %v1048_v50  ;;  %v1051_v53 = vpop.f32.mrb[6].mxu0 }
 0x12a   :  { %v1052_v54 = vpop.f32.mrb[7].mxu0 }
 0x12b   :  { %v661_v55 = vadd.f32 %v1050_v52, %v621_v44 }
 0x12d   :  { %v701_v56 = vadd.f32 %v700_v45, %v661_v55 }
 0x12f   :  { %v706_v57 = vmax.f32 %v701_v56, 0.0 }
 0x131   :  { %v707_v58 = vpack.c.bf16 %v706_v57, %v706_v57 }
 0x133   :  { %1093 = vmatmul.mubr.bf16.vlgmr.msra.gmra.mrb[8].mxu1 %v707_v58 }
 0x206   :  { %v813_v62 = vpop.f32.mrb[8].mxu1 }
 0x207   :  { %v814_v63 = vadd.f32 %v973_v61, %v813_v62  ;;  %v1094_v0 = vpop.f32.mrb[9].mxu1 }
 0x208   :  { %v816_v1 = vpop.f32.mrb[10].mxu1 }
 0x209   :  { %v819_v2 = vmax.f32 %v814_v63, 0.0  ;;  %v1095_v3 = vpop.f32.mrb[11].mxu1 }
 0x20b   :  { %v820_v4 = vpack.c.bf16 %v819_v2, %v819_v2 }
 0x20d   :  { %1105 = vmatmul.mubr.msk.bf16.vlgmr.msra.gmra.mrb[8].mxu0 %vm860_vm2, %v820_v4 }
 0x2e0   :  { %v898_v5 = vpop.f32.mrb[8].mxu0 }
 0x2e1   :  { %v899_v6 = vadd.f32 %v982_v47, %v898_v5  ;;  %v1106_v7 = vpop.f32.mrb[9].mxu0 }
 0x2e2   :  { %v901_v8 = vpop.f32.mrb[10].mxu0 }
 0x2e3   :  { %904 = vst [vmem:[#allocation5] sm:$0xff] %v899_v6  ;;  %v1107_v9 = vpop.f32.mrb[11].mxu0 }
 0x2e4   :  { %909 = vsyncadd [#allocation4], 96  ;;  %s1244_s4 = smov [#allocation5]  }
 0x2e5   :  { %s910_s5 = sshll.u32 %s1244_s4, 4  ;;  %s911_s5 = int_to_ptr.vmem [resolvable:$true] %s910_s5 }
 0x2e6   :  { %s1212_s9 = scalar_lea.vmem %s911_s5, 32  ;;  %s1216_s10 = scalar_lea.vmem %s911_s5, 128 }
 0x2e7   :  { %p1213_p8 = scmp.ne.s32.totalorder %s911_s5, %s1212_s9  ;;  %p1217_p9 = scmp.lt.s32.totalorder %s911_s5, %s911_s5 }
 0x2e8   :  { %p1218_p10 = scmp.lt.s32.totalorder %s1216_s10, %s1212_s9 }
 0x2ea   :  { %p1219_p11 = por %p1218_p10, %p1217_p9 }
 0x2ec   :  { %p1220_p12 = pnand %p1219_p11, %p1213_p8 }
 0x2ee   :  { %1223 = shalt.err (!%p1220_p12)
}
 0x2ef   :  { %s1224_s12 = scalar_lea.hbm %s1417_s7, 32 }
 0x2f0   :  { %p1225_p13 = scmp.ne.s32.totalorder %s1417_s7, %s1224_s12  ;;  %p1228_p0 = scmp.lt.u32.totalorder %s1224_s12, %s1417_s7 }
 0x2f2   :  { %p1230_p1 = pnand %p1228_p0, %p1225_p13 }
 0x2f4   :  { %1233 = shalt.err (!%p1230_p1)
}
 0x2f5   :  { %s1245_s16 = smov 32   ;;  %s1246_s17 = smov 2  }
 0x2f6   :  { %916 = dma.vmem_to_hbm [thread:$0]  %s911_s5, 32, %s1417_s7, [#allocation4], %s1245_s16, %s1245_s16, %s1246_s17  }
 0x2f7   :  { %1236 = dma.done.wait [#allocation4], 128  }
 0x2f8   :  { %1237 = vsyncadd [#allocation4], 4294967168 }
 0x2f9   :  { %920 = vsyncpa [#allocation3], 1 }
 0x2fa   :  { %921 = vsyncpa [#allocation4], 1 }

</bundles_post_ra>
